<compile_context>
chip_gen: v6e
topology: v6e:2x2x1
jax: 0.10.0
libtpu: 0.0.40
codegen_flags: <defaults>
</compile_context>

<pallas_src>
import re

import jax
import jax.numpy as jnp
from jax.experimental import pallas as pl
from jax.experimental.pallas import tpu as pltpu

KEYWORDS = {"on", "in", "to", "into", "from"}


def preprocess_lang(l: str) -> str:
    """Mirrors OneStreamAttenConceptFusion.attend() string handling."""
    sentence = re.sub(r"^\S+\s*", "", l)
    pattern = r"\b(" + "|".join(sorted(KEYWORDS)) + r")\b"
    match = re.search(pattern, sentence)
    if match:
        return sentence[: match.start()].strip()
    return l


def lang_embedding(l: str, hidden: int) -> jnp.ndarray:
    """Deterministic synthetic language embedding (no checkpoint load)."""
    seed = sum(ord(c) for c in l) % (2**31 - 1)
    return 0.1 * jax.random.normal(
        jax.random.PRNGKey(seed), (1, hidden), dtype=jnp.float32
    )


# ----------------------------- Pallas kernels -----------------------------


def stream_kernel(x_ref, sim_ref, w1t_ref, b1_ref, w2_ref, c_ref, o_ref):
    """ConceptFusion attention stream, pixels-on-lanes.

    x_ref   : (C, tile_p)   input pixels (channels on sublanes)
    sim_ref : (1, tile_p)   similarity row
    w1t_ref : (hidden, C)   conv1 weight (transposed), VMEM resident
    b1_ref  : (hidden, 1)   conv1 bias column
    w2_ref  : (hidden, 1)   conv2 weight column
    c_ref   : (1,) SMEM     folded constant  lang @ w2 + b2
    o_ref   : (1, tile_p)   lane-dense logits row
    """
    # 1x1 conv #1 as a channel matmul on the MXU -> (hidden, tile_p), + bias, ReLU
    h = jnp.dot(w1t_ref[...], x_ref[...], preferred_element_type=jnp.float32)
    h = jnp.maximum(h + b1_ref[...], 0.0)
    # 1x1 conv #2 has a single output channel: VPU multiply + sublane reduce
    # (XLU) instead of an N=1 MXU matmul.
    r = jnp.sum(h * w2_ref[...], axis=0, keepdims=True)          # (1, tile_p)
    # sim modulation + folded (lang @ w2 + b2) scalar.
    o_ref[...] = sim_ref[...] * r + c_ref[0]


def softmax_kernel(x_ref, o_ref):
    """Softmax over an entire lane/sublane-dense (rows, 128) logits block."""
    x = x_ref[...]
    m = jnp.max(x, axis=-1, keepdims=True)     # lane reduce   -> (rows, 1)
    m = jnp.max(m, axis=0, keepdims=True)      # sublane reduce -> (1, 1)
    e = jnp.exp(x - m)
    s = jnp.sum(e, axis=-1, keepdims=True)
    s = jnp.sum(s, axis=0, keepdims=True)
    o_ref[...] = e / s


# ------------------------------ wrapper ------------------------------------


def init_params(C: int, hidden: int, key) -> dict:
    k1, k2, k3, k4 = jax.random.split(key, 4)
    return dict(
        w1=0.1 * jax.random.normal(k1, (C, hidden), jnp.float32),
        b1=0.01 * jax.random.normal(k2, (1, hidden), jnp.float32),
        w2=0.1 * jax.random.normal(k3, (hidden, 1), jnp.float32),
        b2=0.01 * jax.random.normal(k4, (1, 1), jnp.float32),
    )


def one_stream_forward(inp_img, lang_goal, sim, params, softmax=True, tile_p=512):
    """Equivalent of OneStreamAttenConceptFusion.forward().

    inp_img : (H, W, C) float32   (PyTorch reshapes to (1,H,W,C) then NCHW)
    sim     : (H, W)    float32   ConceptFusion similarity map
    returns : (H, W, 1) softmaxed attention map (or (1, H*W) raw logits).
    """
    H, W, C = inp_img.shape
    P = H * W
    hidden = params["w1"].shape[1]

    lang = lang_embedding(preprocess_lang(lang_goal), hidden)
    # Fold the language embedding and conv2 bias into a single scalar (SMEM).
    c = (lang @ params["w2"] + params["b2"]).reshape(1).astype(jnp.float32)

    # Pixels-on-lanes layout.  (bf16 inputs would halve HBM bytes on v6e/v7x;
    # kept f32 here to preserve the 1e-5 reference check.)
    x_cp = inp_img.reshape(P, C).T.astype(jnp.float32)            # (C, P)
    sim_row = sim.reshape(1, P).astype(jnp.float32)               # (1, P)
    w1t = params["w1"].T.astype(jnp.float32)                      # (hidden, C)
    b1c = params["b1"].reshape(hidden, 1).astype(jnp.float32)     # (hidden, 1)
    w2c = params["w2"].reshape(hidden, 1).astype(jnp.float32)     # (hidden, 1)

    # Pixel-axis tiling: lane-dense (multiple of 128), clamped to the input
    # size; remainder handled by zero-padding the pixel axis.
    tile_p = pl.cdiv(tile_p, 128) * 128
    tile_p = min(tile_p, pl.cdiv(P, 128) * 128)
    n_tiles = pl.cdiv(P, tile_p)
    P_pad = n_tiles * tile_p
    if P_pad != P:
        x_cp = jnp.pad(x_cp, ((0, 0), (0, P_pad - P)))
        sim_row = jnp.pad(sim_row, ((0, 0), (0, P_pad - P)))

    logits = pl.pallas_call(
        stream_kernel,
        out_shape=jax.ShapeDtypeStruct((1, P_pad), jnp.float32),
        grid=(n_tiles,),
        in_specs=[
            pl.BlockSpec((C, tile_p), lambda i: (0, i)),          # x pixels
            pl.BlockSpec((1, tile_p), lambda i: (0, i)),          # sim row
            pl.BlockSpec((hidden, C), lambda i: (0, 0)),          # w1^T (resident)
            pl.BlockSpec((hidden, 1), lambda i: (0, 0)),          # b1 column
            pl.BlockSpec((hidden, 1), lambda i: (0, 0)),          # w2 column
            pl.BlockSpec(memory_space=pltpu.MemorySpace.SMEM),    # folded scalar c
        ],
        out_specs=pl.BlockSpec((1, tile_p), lambda i: (0, i)),    # lane-dense logits
        compiler_params=pltpu.CompilerParams(
            dimension_semantics=("parallel",)),
    )(x_cp, sim_row, w1t, b1c, w2c, c)

    # PyTorch: logits.permute(1, 2, 3, 0).reshape(1, prod) — identical ordering
    # here since out_channels == batch == 1.
    flat = logits[:, :P]
    if not softmax:
        return flat

    # Softmax on a lane/sublane-dense 2D block (pad with a large negative so
    # padded entries contribute exp(.) == 0).
    rows = pl.cdiv(P, 128)
    P_sm = rows * 128
    padded = flat
    if P_sm != P:
        padded = jnp.pad(flat, ((0, 0), (0, P_sm - P)), constant_values=-1e30)
    blk = padded.reshape(rows, 128)

    probs = pl.pallas_call(
        softmax_kernel,
        out_shape=jax.ShapeDtypeStruct((rows, 128), jnp.float32),
        grid=(1,),
        in_specs=[pl.BlockSpec((rows, 128), lambda i: (0, 0))],
        out_specs=pl.BlockSpec((rows, 128), lambda i: (0, 0)),
    )(blk)

    probs_flat = probs.reshape(1, P_sm)[:, :P]
    # reshape to logits.shape[1:] == (H, W, 1)
    return probs_flat.reshape(H, W, 1)


if __name__ == "__main__":
    key = jax.random.PRNGKey(0)
    H, W, C, hidden = 32, 32, 4, 32   # P = 1024 -> 2 grid steps at tile_p=512
    kimg, ksim, kparams = jax.random.split(key, 3)

    inp_img = jax.random.normal(kimg, (H, W, C), jnp.float32)
    sim = jax.random.uniform(ksim, (H, W), jnp.float32)
    params = init_params(C, hidden, kparams)
    lang_goal = "pack the yellow block into the brown box"

    out = one_stream_forward(inp_img, lang_goal, sim, params, softmax=True)
    out = jax.block_until_ready(out)

    # sanity: shape, softmax normalization, pure-JAX reference (unfolded order)
    assert out.shape == (H, W, 1)
    lang = lang_embedding(preprocess_lang(lang_goal), hidden)
    h_ref = jnp.maximum(inp_img.reshape(-1, C) @ params["w1"] + params["b1"], 0.0)
    h_ref = h_ref * sim.reshape(-1, 1) + lang
    ref_logits = (h_ref @ params["w2"] + params["b2"]).reshape(1, -1)
    ref = jax.nn.softmax(ref_logits, axis=-1).reshape(H, W, 1)
    assert jnp.allclose(out, ref, atol=1e-5, rtol=1e-4), float(
        jnp.max(jnp.abs(out - ref))
    )
    assert abs(float(jnp.sum(out)) - 1.0) < 1e-4

    # also exercise the raw-logits path
    raw = jax.block_until_ready(
        one_stream_forward(inp_img, lang_goal, sim, params, softmax=False)
    )
    assert raw.shape == (1, H * W)
    assert jnp.allclose(raw, ref_logits, atol=1e-5, rtol=1e-4)

    print("KERNEL_OK")
</pallas_src>

<mosaic_0001>
module attributes {stable_mosaic.version = 11 : i64} {
  func.func @stream_kernel(%arg0: i32, %arg1: memref<4x512xf32, #tpu.memory_space<vmem>>, %arg2: memref<1x512xf32, #tpu.memory_space<vmem>>, %arg3: memref<32x4xf32, #tpu.memory_space<vmem>>, %arg4: memref<32x1xf32, #tpu.memory_space<vmem>>, %arg5: memref<32x1xf32, #tpu.memory_space<vmem>>, %arg6: memref<1xf32, #tpu.memory_space<smem>>, %arg7: memref<1x512xf32, #tpu.memory_space<vmem>>) attributes {dimension_semantics = [#tpu.dimension_semantics<parallel>], iteration_bounds = array<i64: 2>, scalar_prefetch = 0 : i64, scratch_operands = 0 : i64, tpu.core_type = #tpu.core_type<tc>, window_params = [{transform_indices = @transform_0, window_bounds = array<i64: 4, 512>}, {transform_indices = @transform_1, window_bounds = array<i64: 1, 512>}, {pipeline_mode = #tpu.pipeline_mode<synchronous>, transform_indices = @transform_2, window_bounds = array<i64: 32, 4>}, {pipeline_mode = #tpu.pipeline_mode<synchronous>, transform_indices = @transform_3, window_bounds = array<i64: 32, 1>}, {pipeline_mode = #tpu.pipeline_mode<synchronous>, transform_indices = @transform_4, window_bounds = array<i64: 32, 1>}, {transform_indices = @transform_5, window_bounds = array<i64: 1>}, {transform_indices = @transform_6, window_bounds = array<i64: 1, 512>}]} {
    %c0 = arith.constant 0 : index
    %c0_0 = arith.constant 0 : index
    %0 = vector.load %arg3[%c0, %c0_0] : memref<32x4xf32, #tpu.memory_space<vmem>>, vector<32x4xf32>
    %c0_1 = arith.constant 0 : index
    %c0_2 = arith.constant 0 : index
    %1 = vector.load %arg1[%c0_1, %c0_2] : memref<4x512xf32, #tpu.memory_space<vmem>>, vector<4x512xf32>
    %cst = arith.constant dense<0.000000e+00> : vector<32x512xf32>
    %2 = tpu.matmul %0, %1, %cst {dimension_numbers = #tpu.dot_dimension_numbers<[1], [0], [0], [1], [0, 0, 1, 1], [], []>} : vector<32x4xf32>, vector<4x512xf32>, vector<32x512xf32> -> vector<32x512xf32>
    %c0_3 = arith.constant 0 : index
    %c0_4 = arith.constant 0 : index
    %3 = vector.load %arg4[%c0_3, %c0_4] : memref<32x1xf32, #tpu.memory_space<vmem>>, vector<32x1xf32>
    %4 = vector.broadcast %3 : vector<32x1xf32> to vector<32x512xf32>
    %5 = arith.addf %2, %4 : vector<32x512xf32>
    %cst_5 = arith.constant 0.000000e+00 : f32
    %6 = vector.broadcast %cst_5 : f32 to vector<32x512xf32>
    %7 = arith.maximumf %5, %6 : vector<32x512xf32>
    %c0_6 = arith.constant 0 : index
    %c0_7 = arith.constant 0 : index
    %8 = vector.load %arg5[%c0_6, %c0_7] : memref<32x1xf32, #tpu.memory_space<vmem>>, vector<32x1xf32>
    %9 = vector.broadcast %8 : vector<32x1xf32> to vector<32x512xf32>
    %10 = arith.mulf %7, %9 : vector<32x512xf32>
    %cst_8 = arith.constant dense<0.000000e+00> : vector<512xf32>
    %11 = vector.multi_reduction <add>, %10, %cst_8 [0] : vector<32x512xf32> to vector<512xf32>
    %12 = vector.shape_cast %11 : vector<512xf32> to vector<1x512xf32>
    %c0_9 = arith.constant 0 : index
    %c0_10 = arith.constant 0 : index
    %13 = vector.load %arg2[%c0_9, %c0_10] : memref<1x512xf32, #tpu.memory_space<vmem>>, vector<1x512xf32>
    %14 = arith.mulf %13, %12 : vector<1x512xf32>
    %c0_11 = arith.constant 0 : index
    %15 = memref.load %arg6[%c0_11] : memref<1xf32, #tpu.memory_space<smem>>
    %16 = vector.broadcast %15 : f32 to vector<1x512xf32>
    %17 = arith.addf %14, %16 : vector<1x512xf32>
    %c0_12 = arith.constant 0 : index
    %c0_13 = arith.constant 0 : index
    %18 = vector.load %arg7[%c0_12, %c0_13] : memref<1x512xf32, #tpu.memory_space<vmem>>, vector<1x512xf32>
    tpu.vector_store %arg7[%c0_12, %c0_13], %17 {strides = array<i32>} : memref<1x512xf32, #tpu.memory_space<vmem>>, vector<1x512xf32>,
    return
  }
  func.func @transform_0(%arg0: i32) -> (i32, i32) {
    %c0_i32 = arith.constant 0 : i32
    %c0_i32_0 = arith.constant 0 : i32
    return %c0_i32, %arg0 : i32, i32
  }
  func.func @transform_1(%arg0: i32) -> (i32, i32) {
    %c0_i32 = arith.constant 0 : i32
    %c0_i32_0 = arith.constant 0 : i32
    return %c0_i32, %arg0 : i32, i32
  }
  func.func @transform_2(%arg0: i32) -> (i32, i32) {
    %c0_i32 = arith.constant 0 : i32
    %c0_i32_0 = arith.constant 0 : i32
    %c0_i32_1 = arith.constant 0 : i32
    return %c0_i32, %c0_i32_0 : i32, i32
  }
  func.func @transform_3(%arg0: i32) -> (i32, i32) {
    %c0_i32 = arith.constant 0 : i32
    %c0_i32_0 = arith.constant 0 : i32
    %c0_i32_1 = arith.constant 0 : i32
    return %c0_i32, %c0_i32_0 : i32, i32
  }
  func.func @transform_4(%arg0: i32) -> (i32, i32) {
    %c0_i32 = arith.constant 0 : i32
    %c0_i32_0 = arith.constant 0 : i32
    %c0_i32_1 = arith.constant 0 : i32
    return %c0_i32, %c0_i32_0 : i32, i32
  }
  func.func @transform_5(%arg0: i32) -> i32 {
    %c0_i32 = arith.constant 0 : i32
    %c0_i32_0 = arith.constant 0 : i32
    return %c0_i32 : i32
  }
  func.func @transform_6(%arg0: i32) -> (i32, i32) {
    %c0_i32 = arith.constant 0 : i32
    %c0_i32_0 = arith.constant 0 : i32
    return %c0_i32, %arg0 : i32, i32
  }
}

</mosaic_0001>

<bundles_post_ra>
// kernel: tpu_custom_call.1
= control target key start
LH: loop header
LB: loop body
LE: loop exit
PB: predicated region body
PF: predicated region fallthrough
CT: control target
= control target key end

     0   :  { %s1034_s0 = inlined_call_operand.vmem [shape: f32[4,1024], index: 0, kind: input, shape index: {}]   ;;  %s1035_s1 = inlined_call_operand.vmem [shape: f32[1,1024], index: 1, kind: input, shape index: {}]   ;;  %s1036_s2 = inlined_call_operand.vmem [shape: f32[32,4], index: 2, kind: input, shape index: {}]   ;;  %s1037_s3 = inlined_call_operand.vmem [shape: f32[32,1], index: 3, kind: input, shape index: {}]   ;;  %s1038_s4 = inlined_call_operand.vmem [shape: f32[32,1], index: 4, kind: input, shape index: {}]   ;;  %s1039_s5 = inlined_call_operand.<no memory space> [shape: f32[1], index: 5, kind: input, shape index: {}]   ;;  %s1040_s6 = inlined_call_operand.hbm [shape: f32[1,1024], index: 6, kind: output, shape index: {}]  }
   0x1   :  { %11 = sst [smem:[#allocation2]] %s1039_s5 }
   0x2   :  { %12 = vsyncpa [#allocation4], 0 }
   0x3   :  { %14 = vsyncpa [#allocation4 + $0x1], 0  ;;  %s897_s23 = smov 0   ;;  %s899_s24 = smov 0  }
   0x4   :  { %s901_s25 = smov 0   ;;  %s903_s26 = smov 0  }
   0x5 LB: > { %s918_s5 = sadd.s32 4294967295, %s853_s26   ;;  %s721_s27 = sadd.s32 4294967294, %s853_s26   ;;  %s853_s26 = sphi %s903_s26, %s1046_s26   ;;  %s849_s25 = sphi %s901_s25, %s1045_s25   ;;  %s845_s24 = sphi %s899_s24, %s1044_s24   ;;  %s841_s23 = sphi %s897_s23, %s1043_s23  }
   0x6   : > { %s922_s28 = sadd.s32 1, %s853_s26   ;;  %s163_s29 = sadd.s32 1, %s849_s25 }
   0x7   : > { %s160_s30 = ssub.s32 %s853_s26, %s922_s28  ;;  %p173_p0 = scmp.ne.s32.totalorder %s849_s25, %s845_s24 }
   0x8   : > { %p161_p1 = scmp.eq.s32.totalorder %s160_s30, 0  ;;  %p174_p2 = scmp.eq.s32.totalorder %s918_s5, 1 }
   0x9   : > { %p179_p3 = scmp.ne.s32.totalorder %s845_s24, %s841_s23  ;;  %p180_p4 = scmp.eq.s32.totalorder %s721_s27, 1 }
   0xa   : > { %s933_s7 = scalar_select %p161_p1, %s849_s25, %s163_s29  }
   0xb   : > { %p935_p5 = por %p174_p2, %p173_p0  ;;  %p939_p6 = por %p180_p4, %p179_p3 }
   0xc   : > { %p724_p7 = scmp.ge.s32.totalorder %s853_s26, 1  ;;  %p227_p8 = scmp.lt.s32.totalorder %s853_s26, 3 }
   0xe   : > { %p228_p9 = pnand %p724_p7, %p227_p8 }
   0xf   : > { %s726_s10 = sshll.u32 (!%p228_p9), %s918_s5, 2  ;;  %s258_s29 = sand.u32 (!%p228_p9), 1, %s845_s24  }
  0x10   : > { %231 = sbr.rel (%p228_p9) target bundleno = 282 (0x11a), region = 44  ;;  %p262_p10 = scmp.lt.s32.totalorder (!%p228_p9), %s726_s10, 7 }
  0x11   : > { %s630_s30 = sld [smem:[#allocation2]] (!%p228_p9)  ;;  %s725_s11 = sshll.u32 (!%p228_p9), %s258_s29, 2 }
  0x12   : > { %s746_s15 = sshll.u32 (!%p228_p9), %s918_s5, 6  ;;  %s260_s16 = scalar_lea.vmem (!%p228_p9), [#allocation3], %s725_s11 }
  0x13   : > { %s653_s17 = sshll.u32 (!%p228_p9), %s260_s16, 4  ;;  %s651_s20 = scalar_lea.hbm (!%p228_p9), %s1040_s6, %s746_s15  ;;  %s654_s17 = int_to_ptr.vmem [resolvable:$true] %s653_s17 }
  0x14   : > { %s793_s21 = scalar_lea.vmem (!%p228_p9), %s654_s17, 64 }
  0x15   : > { %v855_v0 = vmov 0.0   ;;  %v279_v1 = vld [vmem:[%s1037_s3] sm:$0xff]  ;;  %v856_v2 = vmov 0   ;;  %v281_v3 = vld [vmem:[%s1037_s3 + $0x10] sm:$0xff]  ;;  %s1048_s10 = smov (!%p262_p10, %s726_s10), 7  ;;  %v280_v4 = vld [vmem:[%s1037_s3 + $0x8] sm:$0xff]  ;;  %p794_p11 = scmp.ne.s32.totalorder %s654_s17, %s793_s21 }
  0x16   : > { %393 = vmatprep.mubr.f32.mxu0 %v855_v0  ;;  %482 = vmatprep.mubr.f32.mxu1 %v855_v0  ;;  %v282_v5 = vld [vmem:[%s1037_s3 + $0x18] sm:$0xff]  ;;  %s727_s19 = sshll.u32 %s1048_s10, 2  ;;  %vm320_vm0 = vcmask 1043456   ;;  %v273_v10 = vld [vmem:[%s1036_s2] sm:$0xff]  ;;  %vm307_vm1 = vcmask 31744   ;;  %v524_v12 = vld [vmem:[%s1038_s4 + $0x8] sm:$0xff]  ;;  %s270_s14 = scalar_lea.vmem %s1035_s1, %s1048_s10 }
  0x17   : > { %789 = vset.pattern.permute.xlu0 %v856_v2  ;;  %790 = vset.pattern.permute.xlu1 %v856_v2  ;;  %s265_s22 = scalar_lea.vmem %s1034_s0, %s727_s19  ;;  %v523_v11 = vld [vmem:[%s1038_s4] sm:$0xff]  ;;  %v274_v13 = vld [vmem:[%s1036_s2 + $0x8] sm:$0xff]  ;;  %v525_v14 = vld [vmem:[%s1038_s4 + $0x10] sm:$0xff]  ;;  %s639_s10 = scalar_lea.sflag [#allocation4], %s258_s29 }
  0x18   : > { %285 = vperm.xlu0 %789, %v279_v1   ;;  %295 = vperm.xlu1 %790, %v281_v3   ;;  %v277_v6 = vld [vmem:[%s265_s22] sm:$0xff]  ;;  %v278_v7 = vld [vmem:[%s265_s22 + $0x8] sm:$0xff]  ;;  %v526_v15 = vld [vmem:[%s1038_s4 + $0x18] sm:$0xff]  ;;  %p795_p12 = pnand %p794_p11, %p935_p5  ;;  %s858_s22 = smov [#allocation3]  }
  0x19   : > { %v305_v8 = vcombine.high %v277_v6, %v277_v6  ;;  %v306_v9 = vcombine.high %v278_v7, %v278_v7  ;;  %v275_v16 = vld [vmem:[%s1036_s2 + $0x10] sm:$0xff]  ;;  %v276_v17 = vld [vmem:[%s1036_s2 + $0x18] sm:$0xff]  ;;  %s797_s27 = sshll.u32 %s858_s22, 4  ;;  %s798_s27 = int_to_ptr.vmem [resolvable:$false] %s797_s27 }
  0x1a   : > { %p796_p13 = pneg %p795_p12  ;;  %s799_s5 = scalar_lea.vmem %s798_s27, 128 }
  0x1b   : > { %729 = vmatprep.subr.msk.mxu0 %vm320_vm0, %v305_v8  ;;  %735 = vmatprep.subr.msk.mxu1 %vm320_vm0, %v306_v9  ;;  %p800_p0 = scmp.lt.s32.totalorder %s654_s17, %s798_s27  ;;  %p801_p1 = scmp.lt.s32.totalorder %s799_s5, %s793_s21 }
  0x1c   : > { %290 = vperm.xlu0 %789, %v280_v4   ;;  %300 = vperm.xlu1 %790, %v282_v5  }
  0x1d   : > { %730 = vmatpush1.msk.msra.mxu0 %vm320_vm0, %v277_v6  ;;  %736 = vmatpush1.msk.msra.mxu1 %vm320_vm0, %v278_v7  ;;  %p802_p2 = por %p801_p1, %p800_p0 }
  0x1e   : > { %731 = vmatmul.mubr.msk.f32.vlgmr.msra.gmra.mxu0 %vm307_vm1, %v273_v10  ;;  %737 = vmatmul.mubr.msk.f32.vlgmr.msra.gmra.mxu1 %vm307_vm1, %v273_v10 }
  0x1f   : > { %399 = vmatprep.mubr.f32.mxu0 %v855_v0  ;;  %488 = vmatprep.mubr.f32.mxu1 %v855_v0  ;;  %p803_p3 = pnand %p802_p2, %p796_p13 }
  0x20   : > { %529 = vperm.xlu0 %789, %v523_v11   ;;  %534 = vperm.xlu1 %790, %v524_v12  }
  0x22   : > { %732 = vmatmul.mubr.msk.f32.gmra.mxu0 %vm307_vm1, %v274_v13  ;;  %738 = vmatmul.mubr.msk.f32.gmra.mxu1 %vm307_vm1, %v274_v13 }
  0x23   : > { %405 = vmatprep.mubr.f32.mxu0 %v855_v0  ;;  %494 = vmatprep.mubr.f32.mxu1 %v855_v0 }
  0x24   : > { %539 = vperm.xlu0 %789, %v525_v14   ;;  %544 = vperm.xlu1 %790, %v526_v15  }
  0x26   : > { %733 = vmatmul.mubr.msk.f32.gmra.mxu0 %vm307_vm1, %v275_v16  ;;  %739 = vmatmul.mubr.msk.f32.gmra.mxu1 %vm307_vm1, %v275_v16 }
  0x27   : > { %411 = vmatprep.mubr.f32.mxu0 %v855_v0  ;;  %500 = vmatprep.mubr.f32.mxu1 %v855_v0 }
  0x2a   : > { %734 = vmatmul.mubr.msk.f32.gmra.mxu0 %vm307_vm1, %v276_v17  ;;  %740 = vmatmul.mubr.msk.f32.gmra.mxu1 %vm307_vm1, %v276_v17 }
  0x93   : > { %v286_v18 = vpop.permute.xlu0 %285  ;;  %v296_v19 = vpop.permute.xlu1 %295 }
  0x97   : > { %v291_v20 = vpop.permute.xlu0 %290  ;;  %v301_v27 = vpop.permute.xlu1 %300 }
  0x9b   : > { %v530_v32 = vpop.permute.xlu0 %529  ;;  %v535_v47 = vpop.permute.xlu1 %534 }
  0x9f   : > { %v540_v56 = vpop.permute.xlu0 %539 }
  0xde   : > { %v395_v21 = vpop.f32.mrf.mxu0  ;;  %v484_v22 = vpop.f32.mrf.mxu1 }
  0xdf   : > { %v396_v23 = vadd.f32 %v395_v21, %v286_v18  ;;  %v485_v24 = vadd.f32 %v484_v22, %v286_v18  ;;  %v545_v21 = vpop.permute.xlu1 %544 }
  0xe0   : > { %v397_v25 = vpop.f32.mrf.mxu0  ;;  %v486_v26 = vpop.f32.mrf.mxu1 }
  0xe1   : > { %v398_v28 = vadd.f32 %v397_v25, %v286_v18  ;;  %v487_v29 = vadd.f32 %v486_v26, %v286_v18  ;;  %v507_v33 = vmax.f32 %v396_v23, 0.0  ;;  %v509_v34 = vmax.f32 %v485_v24, 0.0 }
  0xe2   : > { %v401_v30 = vpop.f32.mrf.mxu0  ;;  %v490_v31 = vpop.f32.mrf.mxu1 }
  0xe3   : > { %v402_v35 = vadd.f32 %v401_v30, %v291_v20  ;;  %v491_v36 = vadd.f32 %v490_v31, %v291_v20  ;;  %v508_v41 = vmax.f32 %v398_v28, 0.0  ;;  %v510_v42 = vmax.f32 %v487_v29, 0.0 }
  0xe4   : > { %v403_v37 = vpop.f32.mrf.mxu0  ;;  %v492_v38 = vpop.f32.mrf.mxu1  ;;  %v547_v52 = vmul.f32 %v530_v32, %v507_v33  ;;  %v549_v53 = vmul.f32 %v530_v32, %v509_v34 }
  0xe5   : > { %v404_v39 = vadd.f32 %v403_v37, %v291_v20  ;;  %v493_v40 = vadd.f32 %v492_v38, %v291_v20  ;;  %v511_v43 = vmax.f32 %v402_v35, 0.0  ;;  %v513_v44 = vmax.f32 %v491_v36, 0.0 }
  0xe6   : > { %v407_v45 = vpop.f32.mrf.mxu0  ;;  %v496_v46 = vpop.f32.mrf.mxu1  ;;  %v548_v61 = vmul.f32 %v530_v32, %v508_v41  ;;  %v550_v62 = vmul.f32 %v530_v32, %v510_v42 }
  0xe7   : > { %v512_v48 = vmax.f32 %v404_v39, 0.0  ;;  %v514_v49 = vmax.f32 %v493_v40, 0.0  ;;  %v408_v50 = vadd.f32 %v407_v45, %v296_v19  ;;  %v497_v51 = vadd.f32 %v496_v46, %v296_v19 }
  0xe8   : > { %v409_v54 = vpop.f32.mrf.mxu0  ;;  %v498_v55 = vpop.f32.mrf.mxu1  ;;  %v551_v57 = vmul.f32 %v535_v47, %v511_v43  ;;  %v553_v58 = vmul.f32 %v535_v47, %v513_v44  ;;  %v857_v44 = vmov 1966171168   ;;  %v609_v46 = vlaneseq }
  0xe9   : > { %v515_v59 = vmax.f32 %v408_v50, 0.0  ;;  %v517_v60 = vmax.f32 %v497_v51, 0.0  ;;  %v410_v63 = vadd.f32 %v409_v54, %v296_v19  ;;  %v499_v0 = vadd.f32 %v498_v55, %v296_v19 }
  0xea   : > { %v413_v1 = vpop.f32.mrf.mxu0  ;;  %v502_v2 = vpop.f32.mrf.mxu1  ;;  %v552_v3 = vmul.f32 %v535_v47, %v512_v48  ;;  %v554_v4 = vmul.f32 %v535_v47, %v514_v49  ;;  %v563_v13 = vadd.f32 %v551_v57, %v547_v52  ;;  %v581_v14 = vadd.f32 %v553_v58, %v549_v53 }
  0xeb   : > { %v555_v5 = vmul.f32 %v540_v56, %v515_v59  ;;  %v557_v6 = vmul.f32 %v540_v56, %v517_v60  ;;  %v516_v7 = vmax.f32 %v410_v63, 0.0  ;;  %v518_v8 = vmax.f32 %v499_v0, 0.0 }
  0xec   : > { %v414_v9 = vadd.f32 %v413_v1, %v301_v27  ;;  %v503_v10 = vadd.f32 %v502_v2, %v301_v27  ;;  %v415_v11 = vpop.f32.mrf.mxu0  ;;  %v504_v12 = vpop.f32.mrf.mxu1  ;;  %v572_v22 = vadd.f32 %v552_v3, %v548_v61  ;;  %v590_v23 = vadd.f32 %v554_v4, %v550_v62 }
  0xed   : > { %v416_v15 = vadd.f32 %v415_v11, %v301_v27  ;;  %v505_v16 = vadd.f32 %v504_v12, %v301_v27  ;;  %v556_v17 = vmul.f32 %v540_v56, %v516_v7  ;;  %v558_v18 = vmul.f32 %v540_v56, %v518_v8 }
  0xee   : > { %v519_v20 = vmax.f32 %v414_v9, 0.0  ;;  %v521_v19 = vmax.f32 %v503_v10, 0.0  ;;  %v564_v26 = vadd.f32 %v563_v13, %v555_v5  ;;  %v582_v28 = vadd.f32 %v581_v14, %v557_v6  ;;  %v599_v9 = vld [vmem:[%s270_s14] sm:$0xf] }
  0xef   : > { %v520_v24 = vmax.f32 %v416_v15, 0.0  ;;  %v522_v25 = vmax.f32 %v505_v16, 0.0  ;;  %v573_v31 = vadd.f32 %v572_v22, %v556_v17  ;;  %v591_v32 = vadd.f32 %v590_v23, %v558_v18 }
  0xf0   : > { %v559_v29 = vmul.f32 %v545_v21, %v519_v20  ;;  %v561_v30 = vmul.f32 %v545_v21, %v521_v19  ;;  %v607_v45 = vunpack.c.l.s4 %v857_v44  ;;  %v610_v56 = vshrl.u32 %v609_v46, 7 }
  0xf1   : > { %v560_v33 = vmul.f32 %v545_v21, %v520_v24  ;;  %v562_v34 = vmul.f32 %v545_v21, %v522_v25  ;;  %v631_v11 = vstv %s630_s30  ;;  %vm635_vm2 = vcmp.lt.s32.totalorder %v609_v46, 512 }
  0xf2   : > { %v565_v35 = vadd.f32 %v564_v26, %v559_v29  ;;  %v583_v36 = vadd.f32 %v582_v28, %v561_v30  ;;  %v608_v55 = vunpack.c.0.s8 %v607_v45 }
  0xf3   : > { %v574_v27 = vadd.f32 %v573_v31, %v560_v33  ;;  %v592_v37 = vadd.f32 %v591_v32, %v562_v34 }
  0xf4   : > { %v566_v38 = vrot.slane %v565_v35, 4  ;;  %v584_v39 = vrot.slane %v583_v36, 4  ;;  %v611_v63 = vsub.s32 %v608_v55, %v610_v56 }
  0xf5   : > { %v575_v40 = vrot.slane %v574_v27, 4  ;;  %v593_v41 = vrot.slane %v592_v37, 4 }
  0xf6   : > { %v567_v42 = vadd.f32 %v566_v38, %v565_v35  ;;  %v585_v43 = vadd.f32 %v584_v39, %v583_v36 }
  0xf7   : > { %v576_v47 = vadd.f32 %v575_v40, %v574_v27  ;;  %v594_v48 = vadd.f32 %v593_v41, %v592_v37 }
  0xf8   : > { %v568_v49 = vrot.slane %v567_v42, 2  ;;  %v586_v50 = vrot.slane %v585_v43, 2 }
  0xf9   : > { %v577_v51 = vrot.slane %v576_v47, 2  ;;  %v595_v52 = vrot.slane %v594_v48, 2 }
  0xfa   : > { %v569_v53 = vadd.f32 %v568_v49, %v567_v42  ;;  %v587_v54 = vadd.f32 %v586_v50, %v585_v43 }
  0xfb   : > { %v578_v57 = vadd.f32 %v577_v51, %v576_v47  ;;  %v596_v58 = vadd.f32 %v595_v52, %v594_v48 }
  0xfc   : > { %v570_v59 = vrot.slane %v569_v53, 1  ;;  %v588_v60 = vrot.slane %v587_v54, 1 }
  0xfd   : > { %v579_v61 = vrot.slane %v578_v57, 1  ;;  %v597_v62 = vrot.slane %v596_v58, 1 }
  0xfe   : > { %v571_v0 = vadd.f32 %v570_v59, %v569_v53  ;;  %v589_v1 = vadd.f32 %v588_v60, %v587_v54 }
  0xff   : > { %v580_v2 = vadd.f32 %v579_v61, %v578_v57  ;;  %v598_v3 = vadd.f32 %v597_v62, %v596_v58 }
 0x101   : > { %v604_v4 = vcombine.low %v571_v0, %v580_v2  ;;  %v605_v5 = vcombine.low %v589_v1, %v598_v3 }
 0x103   : > { %v612_v6 = vrot.slane %v604_v4, %v611_v63  ;;  %v619_v7 = vrot.slane %v605_v5, %v611_v63 }
 0x105   : > { %v620_v8 = vcombine.low %v612_v6, %v619_v7 }
 0x107   : > { %v627_v10 = vrot.slane %v620_v8, %v611_v63 }
 0x109   : > { %v629_v12 = vmul.f32 %v627_v10, %v599_v9 }
 0x10b   : > { %v632_v13 = vadd.f32 %v631_v11, %v629_v12 }
 0x10d   : > { %637 = vst.msk [vmem:[%s260_s16] sm:$0xf] %vm635_vm2, %v632_v13 }
 0x10e   : > { %806 = shalt.err (!%p803_p3)
}
 0x10f   : > { %s807_s30 = scalar_lea.hbm %s651_s20, 64  ;;  %s811_s12 = scalar_lea.hbm %s1040_s6, 128 }
 0x110   : > { %p808_p4 = scmp.ne.s32.totalorder %s651_s20, %s807_s30  ;;  %p812_p9 = scmp.lt.s32.totalorder %s651_s20, %s1040_s6 }
 0x111   : > { %p813_p10 = scmp.lt.s32.totalorder %s811_s12, %s807_s30 }
 0x112   : > { %p809_p7 = pnand %p808_p4, %p935_p5 }
 0x113   : > { %p814_p11 = por %p813_p10, %p812_p9 }
 0x114   : > { %p810_p8 = pneg %p809_p7 }
 0x116   : > { %p815_p12 = pnand %p814_p11, %p810_p8 }
 0x118   : > { %818 = shalt.err (!%p815_p12)
}
 0x119   : > { %747 = dma.vmem_to_hbm [thread:$0]  (%p935_p5), %s654_s17, 64, %s651_s20, %s639_s10  }
 0x11a PF: > { %p753_p13 = scmp.ge.s32.totalorder %s853_s26, 2  ;;  %s665_s15 = sand.u32 1, %s841_s23  }
 0x11b   : > { %s666_s16 = scalar_lea.sflag [#allocation4], %s665_s15 }
 0x11c   : > { %p750_p0 = pnand %p753_p13, %p939_p6 }
 0x11e   : > { %p751_p1 = pneg %p750_p0 }
 0x120   : > { %836 = dma.done.wait (%p751_p1), %s666_s16, 64  }
 0x121   : > { %838 = vsyncadd (%p751_p1), %s666_s16, 4294967232  ;;  %p17_p2 = scmp.ge.s32.totalorder %s922_s28, 4   ;;  %s1043_s23 = smov %s845_s24 }
 0x122   : > { %s1044_s24 = smov %s849_s25  ;;  %s1045_s25 = smov %s933_s7 }
 0x123   : > { %s1046_s26 = smov %s922_s28  ;;  %19 = sbr.rel (!%p17_p2) target bundleno = 5 (0x5), region = 82 }
 0x128   :  { %671 = vsyncpa [#allocation4], 1 }
 0x129   :  { %673 = vsyncpa [#allocation4 + $0x1], 1 }

</bundles_post_ra>
